<compile_context>
chip_gen: v5e
topology: v5e:2x2
jax: 0.10.0
libtpu: 0.0.40
codegen_flags: <defaults>
</compile_context>

<pallas_src>
import jax
import jax.numpy as jnp
from jax.experimental import pallas as pl
from jax.experimental.pallas import tpu as pltpu


def _residual_mlp_kernel(x_ref, w1_ref, b1_ref, w2_ref, b2_ref, o_ref):
    """out_tile = x_tile + gelu(x_tile @ W1 + b1) @ W2 + b2."""
    x = x_ref[...]                                            # (TM, H) f32
    # MXU in bf16, accumulate in f32.
    h = jnp.dot(x.astype(jnp.bfloat16), w1_ref[...],
                preferred_element_type=jnp.float32) + b1_ref[...]
    h = jax.nn.gelu(h, approximate=True)                      # f32, tanh approx (EUP)
    y = jnp.dot(h.astype(jnp.bfloat16), w2_ref[...],
                preferred_element_type=jnp.float32) + b2_ref[...]
    o_ref[...] = x + y                                        # residual add in f32


def residual_block(x, w1, b1, w2, b2, *, tm=256,
                   vmem_limit_bytes=48 * 1024 * 1024):
    """x: (B, S, H) f32 -> (B, S, H) f32, computed as x + MLP(x).

    Weights are stored (in_features, out_features), i.e. transposed vs torch.
    """
    B, S, H = x.shape
    M = B * S
    F = w1.shape[1]

    # --- token tile: multiple of 8 sublanes, no bigger than the token count ---
    tm = max(8, min(tm, M))
    tm = (tm // 8) * 8
    m_pad = -(-M // tm) * tm                   # ceil(M / tm) * tm
    n_tiles = m_pad // tm

    x2d = x.reshape(M, H)
    if m_pad != M:
        x2d = jnp.pad(x2d, ((0, m_pad - M), (0, 0)))

    # Weights live in bf16 (native MXU rate, half the HBM->VMEM traffic); biases f32.
    w1_bf = w1.astype(jnp.bfloat16)
    w2_bf = w2.astype(jnp.bfloat16)
    b1_2d = b1.reshape(1, F).astype(jnp.float32)
    b2_2d = b2.reshape(1, H).astype(jnp.float32)

    out2d = pl.pallas_call(
        _residual_mlp_kernel,
        out_shape=jax.ShapeDtypeStruct((m_pad, H), jnp.float32),
        grid_spec=pl.GridSpec(
            grid=(n_tiles,),
            in_specs=[
                pl.BlockSpec((tm, H), lambda i: (i, 0)),   # x tile (pipelined)
                pl.BlockSpec((H, F), lambda i: (0, 0)),    # W1 (VMEM-resident)
                pl.BlockSpec((1, F), lambda i: (0, 0)),    # b1
                pl.BlockSpec((F, H), lambda i: (0, 0)),    # W2 (VMEM-resident)
                pl.BlockSpec((1, H), lambda i: (0, 0)),    # b2
            ],
            out_specs=pl.BlockSpec((tm, H), lambda i: (i, 0)),
        ),
        compiler_params=pltpu.CompilerParams(
            dimension_semantics=("parallel",),   # megacore shard on v7x
            vmem_limit_bytes=vmem_limit_bytes,
        ),
    )(x2d, w1_bf, b1_2d, w2_bf, b2_2d)

    if m_pad != M:
        out2d = out2d[:M]
    return out2d.reshape(B, S, H)


if __name__ == "__main__":
    # Small but lane-dense shapes: batch=2, seq=8, hidden=128, intermediate=4*hidden.
    B, S, H = 2, 8, 128
    F = 4 * H

    key = jax.random.PRNGKey(0)
    kx, k1, k2, k3, k4 = jax.random.split(key, 5)

    x = jax.random.normal(kx, (B, S, H), dtype=jnp.float32)
    # Parameters stored as (in, out) — transposed vs torch nn.Linear.weight.
    w1 = jax.random.normal(k1, (H, F), dtype=jnp.float32) * 0.02
    b1 = jax.random.normal(k2, (F,), dtype=jnp.float32) * 0.02
    w2 = jax.random.normal(k3, (F, H), dtype=jnp.float32) * 0.02
    b2 = jax.random.normal(k4, (H,), dtype=jnp.float32) * 0.02

    # tm=8 so this tiny test actually exercises the multi-step pipelined grid.
    out = jax.block_until_ready(residual_block(x, w1, b1, w2, b2, tm=8))

    # Pure-JAX f32 reference of the residual semantics (kernel matmuls run in
    # bf16 with f32 accumulation, hence the relaxed tolerance).
    ref = x + (jax.nn.gelu(x @ w1 + b1, approximate=True) @ w2 + b2)
    assert out.shape == x.shape and out.dtype == x.dtype
    assert jnp.allclose(out, ref, atol=1e-2, rtol=1e-2), (
        float(jnp.max(jnp.abs(out - ref))))

    print("KERNEL_OK")
</pallas_src>

<mosaic_0001>
module attributes {stable_mosaic.version = 11 : i64} {
  func.func @_residual_mlp_kernel(%arg0: i32, %arg1: memref<8x128xf32, #tpu.memory_space<vmem>>, %arg2: memref<128x512xbf16, #tpu.memory_space<vmem>>, %arg3: memref<1x512xf32, #tpu.memory_space<vmem>>, %arg4: memref<512x128xbf16, #tpu.memory_space<vmem>>, %arg5: memref<1x128xf32, #tpu.memory_space<vmem>>, %arg6: memref<8x128xf32, #tpu.memory_space<vmem>>) attributes {dimension_semantics = [#tpu.dimension_semantics<parallel>], iteration_bounds = array<i64: 2>, scalar_prefetch = 0 : i64, scratch_operands = 0 : i64, tpu.core_type = #tpu.core_type<tc>, window_params = [{transform_indices = @transform_0, window_bounds = array<i64: 8, 128>}, {pipeline_mode = #tpu.pipeline_mode<synchronous>, transform_indices = @transform_1, window_bounds = array<i64: 128, 512>}, {pipeline_mode = #tpu.pipeline_mode<synchronous>, transform_indices = @transform_2, window_bounds = array<i64: 1, 512>}, {pipeline_mode = #tpu.pipeline_mode<synchronous>, transform_indices = @transform_3, window_bounds = array<i64: 512, 128>}, {pipeline_mode = #tpu.pipeline_mode<synchronous>, transform_indices = @transform_4, window_bounds = array<i64: 1, 128>}, {transform_indices = @transform_5, window_bounds = array<i64: 8, 128>}]} {
    %c0 = arith.constant 0 : index
    %c0_0 = arith.constant 0 : index
    %0 = vector.load %arg1[%c0, %c0_0] : memref<8x128xf32, #tpu.memory_space<vmem>>, vector<8x128xf32>
    %1 = arith.truncf %0 : vector<8x128xf32> to vector<8x128xbf16>
    %c0_1 = arith.constant 0 : index
    %c0_2 = arith.constant 0 : index
    %2 = vector.load %arg2[%c0_1, %c0_2] : memref<128x512xbf16, #tpu.memory_space<vmem>>, vector<128x512xbf16>
    %cst = arith.constant dense<0.000000e+00> : vector<8x512xf32>
    %3 = tpu.matmul %1, %2, %cst {dimension_numbers = #tpu.dot_dimension_numbers<[1], [0], [0], [1], [0, 0, 1, 1], [], []>} : vector<8x128xbf16>, vector<128x512xbf16>, vector<8x512xf32> -> vector<8x512xf32>
    %c0_3 = arith.constant 0 : index
    %c0_4 = arith.constant 0 : index
    %4 = vector.load %arg3[%c0_3, %c0_4] : memref<1x512xf32, #tpu.memory_space<vmem>>, vector<1x512xf32>
    %5 = vector.broadcast %4 : vector<1x512xf32> to vector<8x512xf32>
    %6 = arith.addf %3, %5 : vector<8x512xf32>
    %7 = arith.mulf %6, %6 : vector<8x512xf32>
    %8 = arith.mulf %6, %7 : vector<8x512xf32>
    %cst_5 = arith.constant 4.471500e-02 : f32
    %9 = vector.broadcast %cst_5 : f32 to vector<8x512xf32>
    %10 = arith.mulf %9, %8 : vector<8x512xf32>
    %11 = arith.addf %6, %10 : vector<8x512xf32>
    %cst_6 = arith.constant 0.797884583 : f32
    %12 = vector.broadcast %cst_6 : f32 to vector<8x512xf32>
    %13 = arith.mulf %12, %11 : vector<8x512xf32>
    %14 = math.tanh %13 : vector<8x512xf32>
    %cst_7 = arith.constant 1.000000e+00 : f32
    %15 = vector.broadcast %cst_7 : f32 to vector<8x512xf32>
    %16 = arith.addf %15, %14 : vector<8x512xf32>
    %cst_8 = arith.constant 5.000000e-01 : f32
    %17 = vector.broadcast %cst_8 : f32 to vector<8x512xf32>
    %18 = arith.mulf %17, %16 : vector<8x512xf32>
    %19 = arith.mulf %6, %18 : vector<8x512xf32>
    %20 = arith.truncf %19 : vector<8x512xf32> to vector<8x512xbf16>
    %c0_9 = arith.constant 0 : index
    %c0_10 = arith.constant 0 : index
    %21 = vector.load %arg4[%c0_9, %c0_10] : memref<512x128xbf16, #tpu.memory_space<vmem>>, vector<512x128xbf16>
    %cst_11 = arith.constant dense<0.000000e+00> : vector<8x128xf32>
    %22 = tpu.matmul %20, %21, %cst_11 {dimension_numbers = #tpu.dot_dimension_numbers<[1], [0], [0], [1], [0, 0, 1, 1], [], []>} : vector<8x512xbf16>, vector<512x128xbf16>, vector<8x128xf32> -> vector<8x128xf32>
    %c0_12 = arith.constant 0 : index
    %c0_13 = arith.constant 0 : index
    %23 = vector.load %arg5[%c0_12, %c0_13] : memref<1x128xf32, #tpu.memory_space<vmem>>, vector<1x128xf32>
    %24 = vector.broadcast %23 : vector<1x128xf32> to vector<8x128xf32>
    %25 = arith.addf %22, %24 : vector<8x128xf32>
    %26 = arith.addf %0, %25 : vector<8x128xf32>
    %c0_14 = arith.constant 0 : index
    %c0_15 = arith.constant 0 : index
    %27 = vector.load %arg6[%c0_14, %c0_15] : memref<8x128xf32, #tpu.memory_space<vmem>>, vector<8x128xf32>
    tpu.vector_store %arg6[%c0_14, %c0_15], %26 {strides = array<i32>} : memref<8x128xf32, #tpu.memory_space<vmem>>, vector<8x128xf32>,
    return
  }
  func.func @transform_0(%arg0: i32) -> (i32, i32) {
    %c0_i32 = arith.constant 0 : i32
    %c0_i32_0 = arith.constant 0 : i32
    return %arg0, %c0_i32 : i32, i32
  }
  func.func @transform_1(%arg0: i32) -> (i32, i32) {
    %c0_i32 = arith.constant 0 : i32
    %c0_i32_0 = arith.constant 0 : i32
    %c0_i32_1 = arith.constant 0 : i32
    return %c0_i32, %c0_i32_0 : i32, i32
  }
  func.func @transform_2(%arg0: i32) -> (i32, i32) {
    %c0_i32 = arith.constant 0 : i32
    %c0_i32_0 = arith.constant 0 : i32
    %c0_i32_1 = arith.constant 0 : i32
    return %c0_i32, %c0_i32_0 : i32, i32
  }
  func.func @transform_3(%arg0: i32) -> (i32, i32) {
    %c0_i32 = arith.constant 0 : i32
    %c0_i32_0 = arith.constant 0 : i32
    %c0_i32_1 = arith.constant 0 : i32
    return %c0_i32, %c0_i32_0 : i32, i32
  }
  func.func @transform_4(%arg0: i32) -> (i32, i32) {
    %c0_i32 = arith.constant 0 : i32
    %c0_i32_0 = arith.constant 0 : i32
    %c0_i32_1 = arith.constant 0 : i32
    return %c0_i32, %c0_i32_0 : i32, i32
  }
  func.func @transform_5(%arg0: i32) -> (i32, i32) {
    %c0_i32 = arith.constant 0 : i32
    %c0_i32_0 = arith.constant 0 : i32
    return %arg0, %c0_i32 : i32, i32
  }
}

</mosaic_0001>

<bundles_post_ra>
// kernel: tpu_custom_call.1
= control target key start
LH: loop header
LB: loop body
LE: loop exit
PB: predicated region body
PF: predicated region fallthrough
CT: control target
= control target key end

     0   :  { %10 = vsyncpa [#allocation3], 0  ;;  %s1847_s0 = inlined_call_operand.hbm [shape: f32[16,128], index: 0, kind: input, shape index: {}]   ;;  %s1848_s1 = inlined_call_operand.hbm [shape: bf16[128,512], index: 1, kind: input, shape index: {}]   ;;  %s1849_s2 = inlined_call_operand.hbm [shape: f32[1,512], index: 2, kind: input, shape index: {}]   ;;  %s1850_s3 = inlined_call_operand.hbm [shape: bf16[512,128], index: 3, kind: input, shape index: {}]   ;;  %s1851_s4 = inlined_call_operand.vmem [shape: f32[1,128], index: 4, kind: input, shape index: {}]   ;;  %s1852_s5 = inlined_call_operand.hbm [shape: f32[16,128], index: 5, kind: output, shape index: {}]  }
   0x1   :  { %12 = vsyncpa [#allocation3 + $0x1], 0 }
   0x2   :  { %13 = vsyncpa [#allocation6], 0 }
   0x3   :  { %14 = vsyncpa [#allocation9], 0 }
   0x4   :  { %15 = vsyncpa [#allocation4], 0 }
   0x5   :  { %17 = vsyncpa [#allocation4 + $0x1], 0  ;;  %s1676_s18 = smov 0   ;;  %s1678_s19 = smov 0  }
   0x6   :  { %s1680_s20 = smov 0   ;;  %s1682_s21 = smov 0  }
   0x7 LB: > { %s175_s24 = sshll.u32 %s1848_s1, 4  ;;  %s1700_s25 = sadd.s32 4294967295, %s1637_s21   ;;  %s1637_s21 = sphi %s1682_s21, %s1863_s21   ;;  %s1633_s20 = sphi %s1680_s20, %s1862_s20   ;;  %s1629_s19 = sphi %s1678_s19, %s1861_s19   ;;  %s1625_s18 = sphi %s1676_s18, %s1860_s18   ;;  %s176_s24 = int_to_ptr.hbm [resolvable:$true] %s175_s24 }
   0x8   : > { %p1016_p0 = scmp.ge.s32.totalorder %s1637_s21, 1  ;;  %p44_p1 = scmp.eq.s32.totalorder %s1700_s25, 0 }
   0x9   : > { %p164_p2 = scmp.lt.s32.totalorder %s1637_s21, 3  ;;  %s1639_s27 = smov [#allocation5]  }
   0xa   : > { %s177_s28 = sshll.u32 %s1639_s27, 4  ;;  %s190_s6 = sshll.u32 %s1849_s2, 4  ;;  %s178_s28 = int_to_ptr.vmem [resolvable:$true] %s177_s28  ;;  %s191_s6 = int_to_ptr.hbm [resolvable:$true] %s190_s6 }
   0xb   : > { %p1705_p3 = pnand %p1016_p0, %p164_p2  ;;  %s201_s10 = sshll.u32 %s1850_s3, 4  ;;  %s202_s10 = int_to_ptr.hbm [resolvable:$true] %s201_s10 }
   0xc   : > { %s1640_s11 = smov [#allocation7]   ;;  %s1641_s13 = smov 256  }
   0xd   : > { %p1369_p4 = pneg %p1705_p3  ;;  %s192_s12 = sshll.u32 %s1640_s11, 4  ;;  %s193_s12 = int_to_ptr.vmem [resolvable:$true] %s192_s12 }
   0xe   : > { %s1642_s14 = smov 16   ;;  %s1643_s15 = smov [#allocation8]  }
   0xf   : > { %p1717_p6 = pnand %p1369_p4, %p44_p1  ;;  %s203_s16 = sshll.u32 %s1643_s15, 4  ;;  %s204_s16 = int_to_ptr.vmem [resolvable:$true] %s203_s16 }
  0x10   : > { %s1644_s17 = smov 64   ;;  %s1645_s22 = smov 4  }
  0x11   : > { %1372 = dma.hbm_to_vmem [thread:$0]  (!%p1717_p6), %s176_s24, 4096, %s178_s28, [#allocation6], %s1641_s13, %s1641_s13, %s1642_s14  }
  0x12   : > { %1375 = dma.hbm_to_vmem [thread:$0]  (!%p1717_p6), %s191_s6, 64, %s193_s12, [#allocation6]  }
  0x13   : > { %1378 = dma.hbm_to_vmem [thread:$0]  (!%p1717_p6), %s202_s10, 4096, %s204_s16, [#allocation9], %s1644_s17, %s1644_s17, %s1645_s22  }
  0x14   : > { %s1015_s23 = sadd.s32 4294967294, %s1637_s21   ;;  %s1732_s24 = sadd.s32 1, %s1637_s21  }
  0x15   : > { %s30_s27 = sadd.s32 1, %s1633_s20  ;;  %s27_s28 = ssub.s32 %s1637_s21, %s1732_s24 }
  0x16   : > { %p37_p7 = scmp.ne.s32.totalorder %s1633_s20, %s1629_s19  ;;  %p28_p8 = scmp.eq.s32.totalorder %s27_s28, 0 }
  0x17   : > { %p38_p9 = scmp.eq.s32.totalorder %s1637_s21, 0  ;;  %p43_p10 = scmp.ne.s32.totalorder %s1629_s19, %s1625_s18 }
  0x18   : > { %p151_p11 = scmp.eq.s32.totalorder %s1700_s25, 1  ;;  %p157_p0 = scmp.eq.s32.totalorder %s1015_s23, 1 }
  0x19   : > { %s1744_s29 = scalar_select %p28_p8, %s1633_s20, %s30_s27  }
  0x1a   : > { %p1748_p12 = por %p44_p1, %p43_p10  ;;  %p1752_p13 = por %p151_p11, %p37_p7 }
  0x1b   : > { %p39_p2 = por %p38_p9, %p37_p7  ;;  %s220_s7 = sand.u32 1, %s1633_s20  }
  0x1c   : > { %p1757_p4 = por %p157_p0, %p43_p10  ;;  %p1390_p6 = scmp.lt.s32.totalorder %s1637_s21, 2 }
  0x1d   : > { %s1021_s9 = sshll.u32 %s220_s7, 3  ;;  %s1022_s10 = sshll.u32 %s1637_s21, 3 }
  0x1e   : > { %s228_s13 = scalar_lea.hbm %s1847_s0, %s1022_s10  ;;  %s224_s15 = scalar_lea.vmem [#allocation2], %s1021_s9 }
  0x1f   : > { %s230_s14 = sshll.u32 %s228_s13, 4  ;;  %s232_s16 = sshll.u32 %s224_s15, 4  ;;  %s231_s14 = int_to_ptr.hbm [resolvable:$true] %s230_s14  ;;  %s233_s16 = int_to_ptr.vmem [resolvable:$true] %s232_s16 }
  0x20   : > { %p1766_p8 = pnand %p1390_p6, %p39_p2  ;;  %s221_s22 = scalar_lea.sflag [#allocation3], %s220_s7 }
  0x21   : > { %s1533_s23 = sshra.s32 %s231_s14, 4  ;;  %s1540_s9 = scalar_lea.hbm %s1847_s0, 16  ;;  %s1534_s23 = int_to_ptr.hbm [resolvable:$true] %s1533_s23 }
  0x22   : > { %s1535_s27 = scalar_lea.hbm %s1534_s23, 8  ;;  %p1537_p9 = pneg %p1766_p8 }
  0x23   : > { %p1536_p7 = scmp.ne.s32.totalorder %s1534_s23, %s1535_s27  ;;  %p1541_p0 = scmp.lt.s32.totalorder %s1534_s23, %s1847_s0 }
  0x24   : > { %p1542_p2 = scmp.lt.s32.totalorder %s1540_s9, %s1535_s27 }
  0x25   : > { %p1538_p10 = pnand %p1537_p9, %p1536_p7 }
  0x26   : > { %p1543_p6 = por %p1542_p2, %p1541_p0 }
  0x27   : > { %p1539_p11 = pneg %p1538_p10 }
  0x29   : > { %p1544_p5 = pnand %p1543_p6, %p1539_p11 }
  0x2b   : > { %1547 = shalt.err (!%p1544_p5)
}
  0x2c   : > { %1382 = dma.hbm_to_vmem [thread:$0]  (!%p1766_p8), %s231_s14, 128, %s233_s16, %s221_s22  }
  0x2d   : > { %241 = sbr.rel (%p1705_p3) target bundleno = 392 (0x188), region = 40  ;;  %s1783_s7 = sand.u32 (!%p1705_p3), 1, %s1629_s19  }
  0x2e   : > { %s1024_s13 = sshll.u32 (!%p1705_p3), %s1783_s7, 3  ;;  %s244_s15 = scalar_lea.sflag (!%p1705_p3), [#allocation3], %s1783_s7 }
  0x2f   : > { %s1789_s23 = scalar_lea.vmem (!%p1705_p3), [#allocation2], %s1024_s13 }
  0x32   : > { %1608 = dma.done.wait (%p1748_p12), %s244_s15, 128  }
  0x33   : > { %1610 = vsyncadd (%p1748_p12), %s244_s15, 4294967168 }
  0x34   : > { %1612 = dma.done.wait (%p44_p1), [#allocation6], 4160  }
  0x35   : > { %1614 = vsyncadd (%p44_p1), [#allocation6], 4294963136 }
  0x36   : > { %1616 = dma.done.wait (%p44_p1), [#allocation9], 4096  }
  0x37   : > { %1618 = vsyncadd (%p44_p1), [#allocation9], 4294963200  ;;  %v1143_v0 = vld [vmem:[#allocation5 + $0xe0] sm:$0xf]  ;;  %v1319_v1 = vld [vmem:[#allocation5 + $0xec] sm:$0xf0] }
  0x38   : > { %v1317_v2 = vld [vmem:[#allocation5 + $0xe4] sm:$0xf]  ;;  %v1144_v3 = vor.u32 %v1319_v1, %v1143_v0  ;;  %v1145_v4 = vld [vmem:[#allocation5 + $0xf0] sm:$0xf0]  ;;  %v1151_v5 = vld [vmem:[#allocation5 + $0xe8] sm:$0xf] }
  0x39   : > { %v1320_v6 = vld [vmem:[#allocation5 + $0xf4] sm:$0xf0]  ;;  %v1148_v7 = vor.u32 %v1317_v2, %v1145_v4  ;;  %v1318_v9 = vld [vmem:[#allocation5 + $0xec] sm:$0xf]  ;;  %v1153_v10 = vld [vmem:[#allocation5 + $0xf8] sm:$0xf0] }
  0x3a   : > { %v1152_v8 = vor.u32 %v1320_v6, %v1151_v5  ;;  %v1127_v11 = vld [vmem:[#allocation5 + $0xc0] sm:$0xf]  ;;  %494 = vmatpush.bf16.msra.mxu0 %v1144_v3  ;;  %v1156_v12 = vor.u32 %v1318_v9, %v1153_v10  ;;  %v1315_v13 = vld [vmem:[#allocation5 + $0xcc] sm:$0xf0]  ;;  %v1313_v14 = vld [vmem:[#allocation5 + $0xc4] sm:$0xf] }
  0x3b   : > { %v1129_v15 = vld [vmem:[#allocation5 + $0xd0] sm:$0xf0]  ;;  %507 = vmatpush.bf16.msra.mxu1 %v1148_v7  ;;  %v1128_v16 = vor.u32 %v1315_v13, %v1127_v11  ;;  %v1135_v18 = vld [vmem:[#allocation5 + $0xc8] sm:$0xf]  ;;  %v1316_v19 = vld [vmem:[#allocation5 + $0xd4] sm:$0xf0] }
  0x3c   : > { %520 = vmatpush.bf16.msra.mxu2 %v1152_v8  ;;  %v1132_v17 = vor.u32 %v1313_v14, %v1129_v15  ;;  %v1314_v20 = vld [vmem:[#allocation5 + $0xcc] sm:$0xf]  ;;  %533 = vmatpush.bf16.msra.mxu3 %v1156_v12  ;;  %v1136_v21 = vor.u32 %v1316_v19, %v1135_v18  ;;  %v1137_v22 = vld [vmem:[#allocation5 + $0xd8] sm:$0xf0]  ;;  %v1111_v23 = vld [vmem:[#allocation5 + $0xa0] sm:$0xf] }
  0x3d   : > { %v1311_v24 = vld [vmem:[#allocation5 + $0xac] sm:$0xf0]  ;;  %v1140_v25 = vor.u32 %v1314_v20, %v1137_v22  ;;  %v1309_v26 = vld [vmem:[#allocation5 + $0xa4] sm:$0xf]  ;;  %v1113_v27 = vld [vmem:[#allocation5 + $0xb0] sm:$0xf0] }
  0x3e   : > { %v1119_v28 = vld [vmem:[#allocation5 + $0xa8] sm:$0xf]  ;;  %495 = vmatpush.bf16.msra.mxu0 %v1128_v16  ;;  %v1112_v29 = vor.u32 %v1311_v24, %v1111_v23  ;;  %v1312_v30 = vld [vmem:[#allocation5 + $0xb4] sm:$0xf0]  ;;  %v1310_v31 = vld [vmem:[#allocation5 + $0xac] sm:$0xf]  ;;  %v1116_v33 = vor.u32 %v1309_v26, %v1113_v27 }
  0x3f   : > { %v1121_v32 = vld [vmem:[#allocation5 + $0xb8] sm:$0xf0]  ;;  %508 = vmatpush.bf16.msra.mxu1 %v1132_v17  ;;  %v1120_v34 = vor.u32 %v1312_v30, %v1119_v28  ;;  %v1095_v35 = vld [vmem:[#allocation5 + $0x80] sm:$0xf]  ;;  %v1307_v36 = vld [vmem:[#allocation5 + $0x8c] sm:$0xf0] }
  0x40   : > { %521 = vmatpush.bf16.msra.mxu2 %v1136_v21  ;;  %v1305_v37 = vld [vmem:[#allocation5 + $0x84] sm:$0xf]  ;;  %534 = vmatpush.bf16.msra.mxu3 %v1140_v25  ;;  %v1124_v38 = vor.u32 %v1310_v31, %v1121_v32  ;;  %v1097_v39 = vld [vmem:[#allocation5 + $0x90] sm:$0xf0]  ;;  %v1103_v40 = vld [vmem:[#allocation5 + $0x88] sm:$0xf]  ;;  %v1096_v44 = vor.u32 %v1307_v36, %v1095_v35 }
  0x41   : > { %v1308_v41 = vld [vmem:[#allocation5 + $0x94] sm:$0xf0]  ;;  %v1306_v42 = vld [vmem:[#allocation5 + $0x8c] sm:$0xf]  ;;  %v1105_v43 = vld [vmem:[#allocation5 + $0x98] sm:$0xf0]  ;;  %v1100_v45 = vor.u32 %v1305_v37, %v1097_v39 }
  0x42   : > { %496 = vmatpush.bf16.msra.mxu0 %v1112_v29  ;;  %v1104_v46 = vor.u32 %v1308_v41, %v1103_v40  ;;  %v1079_v47 = vld [vmem:[#allocation5 + $0x60] sm:$0xf]  ;;  %v1303_v48 = vld [vmem:[#allocation5 + $0x6c] sm:$0xf0]  ;;  %v1301_v49 = vld [vmem:[#allocation5 + $0x64] sm:$0xf]  ;;  %v1108_v50 = vor.u32 %v1306_v42, %v1105_v43 }
  0x43   : > { %509 = vmatpush.bf16.msra.mxu1 %v1116_v33  ;;  %v1081_v51 = vld [vmem:[#allocation5 + $0x70] sm:$0xf0]  ;;  %v1087_v52 = vld [vmem:[#allocation5 + $0x68] sm:$0xf]  ;;  %v1304_v53 = vld [vmem:[#allocation5 + $0x74] sm:$0xf0]  ;;  %v1080_v56 = vor.u32 %v1303_v48, %v1079_v47 }
  0x44   : > { %522 = vmatpush.bf16.msra.mxu2 %v1120_v34  ;;  %535 = vmatpush.bf16.msra.mxu3 %v1124_v38  ;;  %v1302_v54 = vld [vmem:[#allocation5 + $0x6c] sm:$0xf]  ;;  %v1089_v55 = vld [vmem:[#allocation5 + $0x78] sm:$0xf0]  ;;  %v1084_v57 = vor.u32 %v1301_v49, %v1081_v51  ;;  %v1088_v58 = vor.u32 %v1304_v53, %v1087_v52  ;;  %v1063_v59 = vld [vmem:[#allocation5 + $0x40] sm:$0xf] }
  0x45   : > { %v1299_v60 = vld [vmem:[#allocation5 + $0x4c] sm:$0xf0]  ;;  %v1297_v61 = vld [vmem:[#allocation5 + $0x44] sm:$0xf]  ;;  %v1092_v62 = vor.u32 %v1302_v54, %v1089_v55  ;;  %v1065_v63 = vld [vmem:[#allocation5 + $0x50] sm:$0xf0] }
  0x46   : > { %497 = vmatpush.bf16.msra.mxu0 %v1096_v44  ;;  %v1071_v0 = vld [vmem:[#allocation5 + $0x48] sm:$0xf]  ;;  %v1300_v1 = vld [vmem:[#allocation5 + $0x54] sm:$0xf0]  ;;  %v1298_v2 = vld [vmem:[#allocation5 + $0x4c] sm:$0xf]  ;;  %v1064_v4 = vor.u32 %v1299_v60, %v1063_v59  ;;  %v1068_v5 = vor.u32 %v1297_v61, %v1065_v63 }
  0x47   : > { %510 = vmatpush.bf16.msra.mxu1 %v1100_v45  ;;  %v1073_v3 = vld [vmem:[#allocation5 + $0x58] sm:$0xf0]  ;;  %v1072_v6 = vor.u32 %v1300_v1, %v1071_v0  ;;  %v1047_v7 = vld [vmem:[#allocation5 + $0x20] sm:$0xf]  ;;  %v1295_v8 = vld [vmem:[#allocation5 + $0x2c] sm:$0xf0] }
  0x48   : > { %523 = vmatpush.bf16.msra.mxu2 %v1104_v46  ;;  %536 = vmatpush.bf16.msra.mxu3 %v1108_v50  ;;  %v1293_v9 = vld [vmem:[#allocation5 + $0x24] sm:$0xf]  ;;  %v1076_v10 = vor.u32 %v1298_v2, %v1073_v3  ;;  %v1049_v11 = vld [vmem:[#allocation5 + $0x30] sm:$0xf0]  ;;  %v1055_v12 = vld [vmem:[#allocation5 + $0x28] sm:$0xf]  ;;  %v1048_v16 = vor.u32 %v1295_v8, %v1047_v7 }
  0x49   : > { %v1296_v13 = vld [vmem:[#allocation5 + $0x34] sm:$0xf0]  ;;  %v1294_v14 = vld [vmem:[#allocation5 + $0x2c] sm:$0xf]  ;;  %v1057_v15 = vld [vmem:[#allocation5 + $0x38] sm:$0xf0]  ;;  %v1052_v17 = vor.u32 %v1293_v9, %v1049_v11 }
  0x4a   : > { %498 = vmatpush.bf16.msra.mxu0 %v1080_v56  ;;  %v1056_v18 = vor.u32 %v1296_v13, %v1055_v12  ;;  %v1031_v19 = vld [vmem:[#allocation5] sm:$0xf]  ;;  %v1291_v20 = vld [vmem:[#allocation5 + $0xc] sm:$0xf0]  ;;  %v1289_v21 = vld [vmem:[#allocation5 + $0x4] sm:$0xf]  ;;  %v1060_v22 = vor.u32 %v1294_v14, %v1057_v15 }
  0x4b   : > { %511 = vmatpush.bf16.msra.mxu1 %v1084_v57  ;;  %v1033_v23 = vld [vmem:[#allocation5 + $0x10] sm:$0xf0]  ;;  %v1039_v24 = vld [vmem:[#allocation5 + $0x8] sm:$0xf]  ;;  %v1292_v25 = vld [vmem:[#allocation5 + $0x14] sm:$0xf0]  ;;  %v1032_v28 = vor.u32 %v1291_v20, %v1031_v19 }
  0x4c   : > { %524 = vmatpush.bf16.msra.mxu2 %v1088_v58  ;;  %537 = vmatpush.bf16.msra.mxu3 %v1092_v62  ;;  %v1290_v26 = vld [vmem:[#allocation5 + $0xc] sm:$0xf]  ;;  %v1041_v27 = vld [vmem:[#allocation5 + $0x18] sm:$0xf0]  ;;  %v1036_v30 = vor.u32 %v1289_v21, %v1033_v23  ;;  %v1040_v31 = vor.u32 %v1292_v25, %v1039_v24  ;;  %v1327_v36 = vld [vmem:[#allocation8 + $0x30] sm:$0xff]  ;;  %s1286_s14 = sshll.u32 %s1700_s25, 3 }
  0x4d   : > { %v1804_v29 = vld [vmem:[%s1789_s23] sm:$0xff]  ;;  %v1044_v32 = vor.u32 %v1290_v26, %v1041_v27  ;;  %v1325_v44 = vld [vmem:[#allocation8 + $0x20] sm:$0xff]  ;;  %v324_v0 = vld [vmem:[#allocation7] sm:$0xf]  ;;  %s911_s22 = scalar_lea.hbm %s1852_s5, %s1286_s14  ;;  %s289_s27 = scalar_lea.vmem [#allocation10], %s1024_s13 }
  0x4e   : > { %499 = vmatpush.bf16.msra.mxu0 %v1064_v4  ;;  %v1328_v33 = vld [vmem:[#allocation8 + $0x38] sm:$0xff]  ;;  %v291_v34 = vpack.c.bf16 %v1804_v29, %v1804_v29  ;;  %v1335_v37 = vld [vmem:[#allocation8 + $0x70] sm:$0xff]  ;;  %v1326_v40 = vld [vmem:[#allocation8 + $0x28] sm:$0xff]  ;;  %v326_v1 = vperm.slane %v324_v0, 0  ;;  %v327_v4 = vperm.slane %v324_v0, 1  ;;  %v328_v11 = vperm.slane %v324_v0, 2 }
  0x4f   : > { %512 = vmatpush.bf16.msra.mxu1 %v1068_v5  ;;  %v1336_v35 = vld [vmem:[#allocation8 + $0x78] sm:$0xff]  ;;  %v1334_v41 = vld [vmem:[#allocation8 + $0x68] sm:$0xff]  ;;  %v1343_v42 = vld [vmem:[#allocation8 + $0xb0] sm:$0xff]  ;;  %v329_v13 = vperm.slane %v324_v0, 3  ;;  %s913_s28 = sshll.u32 %s289_s27, 4  ;;  %s915_s10 = sshll.u32 %s911_s22, 4  ;;  %s914_s28 = int_to_ptr.vmem [resolvable:$true] %s913_s28  ;;  %s916_s10 = int_to_ptr.hbm [resolvable:$true] %s915_s10 }
  0x50   : > { %525 = vmatpush.bf16.msra.mxu2 %v1072_v6  ;;  %538 = vmatpush.bf16.msra.mxu3 %v1076_v10  ;;  %v1344_v38 = vld [vmem:[#allocation8 + $0xb8] sm:$0xff]  ;;  %v1351_v43 = vld [vmem:[#allocation8 + $0xf0] sm:$0xff]  ;;  %v1333_v45 = vld [vmem:[#allocation8 + $0x60] sm:$0xff]  ;;  %s901_s25 = scalar_lea.sflag [#allocation4], %s1783_s7  ;;  %s1577_s9 = sshra.s32 %s916_s10, 4  ;;  %s1578_s9 = int_to_ptr.hbm [resolvable:$true] %s1577_s9 }
  0x51   : > { %v1352_v39 = vld [vmem:[#allocation8 + $0xf8] sm:$0xff]  ;;  %v1342_v46 = vld [vmem:[#allocation8 + $0xa8] sm:$0xff]  ;;  %v1341_v50 = vld [vmem:[#allocation8 + $0xa0] sm:$0xff]  ;;  %s1579_s11 = scalar_lea.hbm %s1578_s9, 8  ;;  %s1583_s13 = scalar_lea.hbm %s1852_s5, 16 }
  0x52   : > { %500 = vmatpush.bf16.msra.mxu0 %v1048_v16  ;;  %v1350_v47 = vld [vmem:[#allocation8 + $0xe8] sm:$0xff]  ;;  %v1324_v48 = vld [vmem:[#allocation8 + $0x18] sm:$0xff]  ;;  %v1349_v51 = vld [vmem:[#allocation8 + $0xe0] sm:$0xff]  ;;  %p1580_p1 = scmp.ne.s32.totalorder %s1578_s9, %s1579_s11  ;;  %p1584_p12 = scmp.lt.s32.totalorder %s1578_s9, %s1852_s5 }
  0x53   : > { %513 = vmatpush.bf16.msra.mxu1 %v1052_v17  ;;  %v1332_v49 = vld [vmem:[#allocation8 + $0x58] sm:$0xff]  ;;  %v1323_v52 = vld [vmem:[#allocation8 + $0x10] sm:$0xff]  ;;  %v1322_v56 = vld [vmem:[#allocation8 + $0x8] sm:$0xff]  ;;  %p1585_p8 = scmp.lt.s32.totalorder %s1583_s13, %s1579_s11 }
  0x54   : > { %526 = vmatpush.bf16.msra.mxu2 %v1056_v18  ;;  %539 = vmatpush.bf16.msra.mxu3 %v1060_v22  ;;  %v1331_v53 = vld [vmem:[#allocation8 + $0x50] sm:$0xff]  ;;  %v1340_v54 = vld [vmem:[#allocation8 + $0x98] sm:$0xff]  ;;  %v1330_v57 = vld [vmem:[#allocation8 + $0x48] sm:$0xff]  ;;  %p1581_p3 = pnand %p1580_p1, %p1752_p13 }
  0x55   : > { %v1348_v55 = vld [vmem:[#allocation8 + $0xd8] sm:$0xff]  ;;  %v1339_v58 = vld [vmem:[#allocation8 + $0x90] sm:$0xff]  ;;  %v1321_v60 = vld [vmem:[#allocation8] sm:$0xff]  ;;  %p1586_p7 = por %p1585_p8, %p1584_p12 }
  0x56   : > { %501 = vmatpush.bf16.msra.mxu0 %v1032_v28  ;;  %v1347_v59 = vld [vmem:[#allocation8 + $0xd0] sm:$0xff]  ;;  %v1329_v61 = vld [vmem:[#allocation8 + $0x40] sm:$0xff]  ;;  %v1338_v62 = vld [vmem:[#allocation8 + $0x88] sm:$0xff]  ;;  %p1582_p5 = pneg %p1581_p3 }
  0x57   : > { %514 = vmatpush.bf16.msra.mxu1 %v1036_v30  ;;  %v1346_v63 = vld [vmem:[#allocation8 + $0xc8] sm:$0xff]  ;;  %v1337_v2 = vld [vmem:[#allocation8 + $0x80] sm:$0xff] }
  0x58   : > { %527 = vmatpush.bf16.msra.mxu2 %v1040_v31  ;;  %540 = vmatpush.bf16.msra.mxu3 %v1044_v32  ;;  %v1345_v3 = vld [vmem:[#allocation8 + $0xc0] sm:$0xff]  ;;  %p1587_p9 = pnand %p1586_p7, %p1582_p5 }
  0x59   : > { %502 = vmatmul.bf16.vlgmr.msra.gmra.mxu0 %v291_v34 }
  0x5a   : > { %846 = vmatpush.bf16.msrb.mxu0 %v1328_v33  ;;  %515 = vmatmul.bf16.vlgmr.msra.gmra.mxu1 %v291_v34 }
  0x5b   : > { %859 = vmatpush.bf16.msrb.mxu1 %v1336_v35  ;;  %528 = vmatmul.bf16.vlgmr.msra.gmra.mxu2 %v291_v34 }
  0x5c   : > { %541 = vmatmul.bf16.vlgmr.msra.gmra.mxu3 %v291_v34  ;;  %872 = vmatpush.bf16.msrb.mxu2 %v1344_v38 }
  0x5d   : > { %885 = vmatpush.bf16.msrb.mxu3 %v1352_v39 }
  0x5e   : > { %847 = vmatpush.bf16.msrb.mxu0 %v1327_v36 }
  0x5f   : > { %860 = vmatpush.bf16.msrb.mxu1 %v1335_v37 }
  0x60   : > { %873 = vmatpush.bf16.msrb.mxu2 %v1343_v42 }
  0x61   : > { %886 = vmatpush.bf16.msrb.mxu3 %v1351_v43 }
  0x62   : > { %848 = vmatpush.bf16.msrb.mxu0 %v1326_v40 }
  0x63   : > { %861 = vmatpush.bf16.msrb.mxu1 %v1334_v41 }
  0x64   : > { %874 = vmatpush.bf16.msrb.mxu2 %v1342_v46 }
  0x65   : > { %887 = vmatpush.bf16.msrb.mxu3 %v1350_v47 }
  0x66   : > { %849 = vmatpush.bf16.msrb.mxu0 %v1325_v44 }
  0x67   : > { %862 = vmatpush.bf16.msrb.mxu1 %v1333_v45 }
  0x68   : > { %875 = vmatpush.bf16.msrb.mxu2 %v1341_v50 }
  0x69   : > { %888 = vmatpush.bf16.msrb.mxu3 %v1349_v51 }
  0x6a   : > { %850 = vmatpush.bf16.msrb.mxu0 %v1324_v48 }
  0x6b   : > { %863 = vmatpush.bf16.msrb.mxu1 %v1332_v49 }
  0x6c   : > { %876 = vmatpush.bf16.msrb.mxu2 %v1340_v54 }
  0x6d   : > { %889 = vmatpush.bf16.msrb.mxu3 %v1348_v55 }
  0x6e   : > { %851 = vmatpush.bf16.msrb.mxu0 %v1323_v52 }
  0x6f   : > { %864 = vmatpush.bf16.msrb.mxu1 %v1331_v53 }
  0x70   : > { %877 = vmatpush.bf16.msrb.mxu2 %v1339_v58 }
  0x71   : > { %890 = vmatpush.bf16.msrb.mxu3 %v1347_v59 }
  0x72   : > { %852 = vmatpush.bf16.msrb.mxu0 %v1322_v56 }
  0x73   : > { %865 = vmatpush.bf16.msrb.mxu1 %v1330_v57 }
  0x74   : > { %878 = vmatpush.bf16.msrb.mxu2 %v1338_v62  ;;  %v1434_v62 = vld [vmem:[%s1851_s4] ss:$0 sm:$0xff] }
  0x75   : > { %891 = vmatpush.bf16.msrb.mxu3 %v1346_v63 }
  0x76   : > { %853 = vmatpush.bf16.msrb.mxu0 %v1321_v60 }
  0x77   : > { %866 = vmatpush.bf16.msrb.mxu1 %v1329_v61 }
  0x78   : > { %879 = vmatpush.bf16.msrb.mxu2 %v1337_v2 }
  0x79   : > { %892 = vmatpush.bf16.msrb.mxu3 %v1345_v3 }
  0xd6   : > { %v503_v5 = vpop.f32.mrf.mxu0 }
  0xd7   : > { %v504_v6 = vadd.f32 %v503_v5, %v326_v1  ;;  %v516_v7 = vpop.f32.mrf.mxu1 }
  0xd8   : > { %v517_v8 = vadd.f32 %v516_v7, %v327_v4 }
  0xd9   : > { %v546_v9 = vmul.f32 %v504_v6, %v504_v6 }
  0xda   : > { %v547_v10 = vmul.f32 %v517_v8, %v517_v8 }
  0xdb   : > { %v550_v12 = vmul.f32 %v546_v9, %v504_v6 }
  0xdc   : > { %v551_v14 = vmul.f32 %v547_v10, %v517_v8 }
  0xdd   : > { %v554_v15 = vmul.f32 0.044715, %v550_v12 }
  0xde   : > { %v529_v16 = vpop.f32.mrf.mxu2  ;;  %v555_v17 = vmul.f32 0.044715, %v551_v14  ;;  %v505_v20 = vpop.f32.mrf.mxu0 }
  0xdf   : > { %v530_v18 = vadd.f32 %v529_v16, %v328_v11  ;;  %v542_v19 = vpop.f32.mrf.mxu3  ;;  %v558_v21 = vadd.f32 %v554_v15, %v504_v6  ;;  %v518_v23 = vpop.f32.mrf.mxu1 }
  0xe0   : > { %v543_v22 = vadd.f32 %v542_v19, %v329_v13  ;;  %v559_v24 = vadd.f32 %v555_v17, %v517_v8 }
  0xe1   : > { %v548_v25 = vmul.f32 %v530_v18, %v530_v18  ;;  %v562_v26 = vmul.f32 0.7978846, %v558_v21 }
  0xe2   : > { %v549_v27 = vmul.f32 %v543_v22, %v543_v22  ;;  %v563_v28 = vmul.f32 0.7978846, %v559_v24 }
  0xe3   : > { %v552_v30 = vmul.f32 %v548_v25, %v530_v18  ;;  %1435 = vtanh.f32 %v562_v26 }
  0xe4   : > { %v553_v31 = vmul.f32 %v549_v27, %v543_v22  ;;  %1437 = vtanh.f32 %v563_v28 }
  0xe5   : > { %v556_v32 = vmul.f32 0.044715, %v552_v30 }
  0xe6   : > { %v557_v33 = vmul.f32 0.044715, %v553_v31  ;;  %v531_v34 = vpop.f32.mrf.mxu2 }
  0xe7   : > { %v560_v35 = vadd.f32 %v556_v32, %v530_v18  ;;  %v544_v36 = vpop.f32.mrf.mxu3 }
  0xe8   : > { %v561_v37 = vadd.f32 %v557_v33, %v543_v22 }
  0xe9   : > { %v564_v38 = vmul.f32 0.7978846, %v560_v35  ;;  %v1436_v39 = vpop.eup %1435 }
  0xea   : > { %v565_v40 = vmul.f32 0.7978846, %v561_v37  ;;  %v1438_v41 = vpop.eup %1437  ;;  %v570_v42 = vadd.f32 1.0, %v1436_v39 }
  0xeb   : > { %1439 = vtanh.f32 %v564_v38  ;;  %v571_v43 = vadd.f32 1.0, %v1438_v41 }
  0xec   : > { %1441 = vtanh.f32 %v565_v40  ;;  %v574_v44 = vmul.f32 0.5, %v570_v42 }
  0xed   : > { %v575_v45 = vmul.f32 0.5, %v571_v43 }
  0xee   : > { %v578_v46 = vmul.f32 %v574_v44, %v504_v6 }
  0xef   : > { %v579_v47 = vmul.f32 %v575_v45, %v517_v8 }
  0xf0   : > { %v582_v49 = vpack.c.bf16 %v578_v46, %v578_v46 }
  0xf1   : > { %v1440_v48 = vpop.eup %1439  ;;  %v583_v51 = vpack.c.bf16 %v579_v47, %v579_v47 }
  0xf2   : > { %v1442_v50 = vpop.eup %1441  ;;  %v572_v52 = vadd.f32 1.0, %v1440_v48  ;;  %854 = vmatmul.bf16.vlgmr.msrb.gmra.mxu0 %v582_v49 }
  0xf3   : > { %v573_v53 = vadd.f32 1.0, %v1442_v50  ;;  %867 = vmatmul.bf16.vlgmr.msrb.gmra.mxu1 %v583_v51 }
  0xf4   : > { %v576_v54 = vmul.f32 0.5, %v572_v52 }
  0xf5   : > { %v577_v55 = vmul.f32 0.5, %v573_v53 }
  0xf6   : > { %v580_v56 = vmul.f32 %v576_v54, %v530_v18 }
  0xf7   : > { %v581_v57 = vmul.f32 %v577_v55, %v543_v22 }
  0xf8   : > { %v584_v58 = vpack.c.bf16 %v580_v56, %v580_v56 }
  0xf9   : > { %v585_v59 = vpack.c.bf16 %v581_v57, %v581_v57 }
  0xfa   : > { %880 = vmatmul.bf16.vlgmr.msrb.gmra.mxu2 %v584_v58 }
  0xfb   : > { %893 = vmatmul.bf16.vlgmr.msrb.gmra.mxu3 %v585_v59 }
 0x16f   : > { %v855_v60 = vpop.f32.mrf.mxu0 }
 0x170   : > { %v868_v61 = vpop.f32.mrf.mxu1  ;;  %v856_v63 = vadd.f32 %v1434_v62, %v855_v60 }
 0x172   : > { %v869_v2 = vadd.f32 %v868_v61, %v856_v63 }
 0x177   : > { %v857_v0 = vpop.f32.mrf.mxu0 }
 0x178   : > { %v870_v1 = vpop.f32.mrf.mxu1 }
 0x17d   : > { %v881_v3 = vpop.f32.mrf.mxu2 }
 0x17e   : > { %v882_v4 = vadd.f32 %v881_v3, %v869_v2  ;;  %v894_v5 = vpop.f32.mrf.mxu3 }
 0x180   : > { %v895_v6 = vadd.f32 %v894_v5, %v882_v4 }
 0x182   : > { %v898_v7 = vadd.f32 %v895_v6, %v1804_v29 }
 0x184   : > { %899 = vst [vmem:[%s289_s27] sm:$0xff] %v898_v7 }
 0x185   : > { %v883_v8 = vpop.f32.mrf.mxu2 }
 0x186   : > { %1590 = shalt.err (!%p1587_p9)
}
 0x187   : > { %1367 = dma.vmem_to_hbm [thread:$0]  (%p1752_p13), %s914_s28, 128, %s916_s10, %s901_s25   ;;  %v896_v29 = vpop.f32.mrf.mxu3 }
 0x188 PF: > { %s927_s7 = sand.u32 1, %s1625_s18   ;;  %p1859_p10 = scmp.ge.s32.totalorder %s1637_s21, 2 }
 0x189   : > { %s928_s30 = scalar_lea.sflag [#allocation4], %s927_s7 }
 0x18a   : > { %p1384_p11 = pnand %p1859_p10, %p1757_p4 }
 0x18c   : > { %p1385_p0 = pneg %p1384_p11 }
 0x18e   : > { %1620 = dma.done.wait (%p1385_p0), %s928_s30, 128  }
 0x18f   : > { %1622 = vsyncadd (%p1385_p0), %s928_s30, 4294967168  ;;  %p20_p2 = scmp.ge.s32.totalorder %s1732_s24, 4   ;;  %s1860_s18 = smov %s1629_s19 }
 0x190   : > { %s1861_s19 = smov %s1633_s20  ;;  %s1862_s20 = smov %s1744_s29 }
 0x191   : > { %s1863_s21 = smov %s1732_s24  ;;  %22 = sbr.rel (!%p20_p2) target bundleno = 7 (0x7), region = 97 }
 0x196   :  { %934 = vsyncpa [#allocation3], 1 }
 0x197   :  { %936 = vsyncpa [#allocation3 + $0x1], 1 }
 0x198   :  { %937 = vsyncpa [#allocation6], 1 }
 0x199   :  { %938 = vsyncpa [#allocation9], 1 }
 0x19a   :  { %939 = vsyncpa [#allocation4], 1 }
 0x19b   :  { %941 = vsyncpa [#allocation4 + $0x1], 1 }

</bundles_post_ra>
